<compile_context>
chip_gen: v6e
topology: v6e:2x2x1
jax: 0.10.0
libtpu: 0.0.40
codegen_flags: <defaults>
</compile_context>

<pallas_src>
import functools

import jax
import jax.numpy as jnp
from jax.experimental import pallas as pl
from jax.experimental.pallas import tpu as pltpu

_LANE = 128


def _round_up(x, m):
    return (x + m - 1) // m * m


def _vmem_capacity_bytes():
    try:
        return int(pltpu.get_tpu_info().vmem_capacity_bytes)
    except Exception:
        return 64 * 1024 * 1024  # conservative fallback: v7x per-TC VMEM


def _num_tensorcores():
    # v7x exposes 2 TensorCores per chip; v5e/v6e expose 1.
    try:
        kind = jax.devices()[0].device_kind.lower()
        if "v7" in kind:
            return 2
    except Exception:
        pass
    return 1


def _pick_tile_hw(hw, c, itemsize, budget, n, num_cores):
    """Fixed-size lane tile for the split (broadcast-multiply) path.

    Prefers 512-2048 lanes (near HBM roofline), capped so that each TensorCore
    still gets >= ~4 grid steps and the double-buffered in+out blocks fit the
    VMEM budget.  Does NOT require the tile to divide HW (grid uses pl.cdiv).
    """
    min_steps = 4 * max(num_cores, 1)
    cands = []
    for t in (2048, 1024, 512, 256, 128):
        if t >= hw:
            t = hw  # full extent: always a legal block dim
        if 4 * c * t * itemsize <= budget and t not in cands:
            cands.append(t)
    if not cands:
        # Degenerate (enormous C): smallest legal lane tile; vmem_limit covers it.
        return min(_LANE, hw)
    for t in cands:  # descending
        if n * pl.cdiv(hw, t) >= min_steps:
            return t
    return cands[-1]


def _arm_fused_kernel(x_ref, w_ref, b_ref, o_ref, *, inv_hw):
    # x_ref: (1, C, HW) input dtype; w_ref: (C, C); b_ref: (C, 1); o_ref like x_ref.
    x = x_ref[0]                                                    # (C, HW)

    # Adaptive avg-pool to (1, 1): spatial sum on the MXU via a ones-vector matmul
    # (f32 accumulation), keeping the VALU/XLU slots free on this mem-bound kernel.
    ones = jnp.ones((x.shape[1], 1), dtype=x.dtype)                 # (HW, 1)
    mean = jnp.dot(x, ones, preferred_element_type=jnp.float32) * inv_hw   # (C, 1) f32

    # 1x1 conv on the pooled vector: tiny (C, C) @ (C, 1) matmul + bias, all in f32.
    z = jnp.dot(w_ref[...].astype(jnp.float32), mean,
                preferred_element_type=jnp.float32)                 # (C, 1) f32
    z = z + b_ref[...].astype(jnp.float32)

    gate = jax.nn.sigmoid(z)                                        # (C, 1) f32

    # Broadcast multiply in the input dtype (matches a same-dtype PyTorch model;
    # avoids a full-tile f32 intermediate).
    o_ref[0] = x * gate.astype(x.dtype)


def _arm_mul_kernel(x_ref, g_ref, o_ref):
    # Split (precomputed-gate) path: pure broadcast multiply.
    x = x_ref[0]                                                    # (C, tile_hw)
    o_ref[0] = x * g_ref[0].astype(x.dtype)                         # g_ref[0]: (C, 1)


def attention_refinement_module(x_nchw, weight, bias, *,
                                force_split=False,
                                force_single_buffered=False,
                                donate_input=False):
    """x_nchw: (N, C, H, W); weight: (C_out, C_in) (or conv (C,C,1,1)); bias: (C_out,)."""
    if weight.ndim == 4:  # accept raw nn.Conv2d(C, C, 1).weight layout
        weight = weight.reshape(weight.shape[0], weight.shape[1])
    n, c, h, w = x_nchw.shape
    c_out, c_in = weight.shape
    assert c_in == c, "in_channels mismatch"
    assert c_out == c, "broadcast in torch.mul requires out_channels == in_channels"

    hw = h * w
    x_flat = x_nchw.reshape(n, c, hw)

    x_itemsize = jnp.dtype(x_nchw.dtype).itemsize
    capacity = _vmem_capacity_bytes()
    budget = int(0.75 * capacity)
    num_cores = _num_tensorcores()

    block_bytes = c * hw * x_itemsize
    param_bytes = 2 * (c * c * jnp.dtype(weight.dtype).itemsize + c * 4)
    need_db = 4 * block_bytes + param_bytes   # double-buffered in + out whole image
    need_sb = 2 * block_bytes + param_bytes   # single-buffered (pl.Buffered(1))

    single_buffered = False
    if force_split:
        use_split = True
    elif force_single_buffered:
        use_split, single_buffered = False, True
    elif num_cores > 1 and n < num_cores:
        # v7x with N < 2: grid=(N,) would leave a TensorCore idle on a mem-bound op.
        # TODO(synk): core-split fused variant (each TC pools half of HW, exchanges
        # the (C,1) partial sums via CMEM + core_barrier, multiplies its half) would
        # keep the single HBM read while using both TensorCores.
        use_split = True
    elif need_db <= budget:
        use_split = False
    elif need_sb <= budget:
        use_split, single_buffered = False, True
    else:
        use_split = True

    io_aliases = {0: 0} if donate_input else {}

    if not use_split:
        pm = pl.Buffered(1) if single_buffered else None
        need = need_sb if single_buffered else need_db
        vmem_limit = int(min(0.9 * capacity, max(need + (4 << 20), 32 << 20)))
        out_flat = pl.pallas_call(
            functools.partial(_arm_fused_kernel, inv_hw=1.0 / float(hw)),
            out_shape=jax.ShapeDtypeStruct((n, c, hw), x_nchw.dtype),
            grid_spec=pltpu.PrefetchScalarGridSpec(
                num_scalar_prefetch=0,
                grid=(n,),
                in_specs=[
                    pl.BlockSpec((1, c, hw), lambda i: (i, 0, 0), pipeline_mode=pm),
                    pl.BlockSpec((c_out, c_in), lambda i: (0, 0)),
                    pl.BlockSpec((c_out, 1), lambda i: (0, 0)),
                ],
                out_specs=pl.BlockSpec((1, c, hw), lambda i: (i, 0, 0),
                                       pipeline_mode=pm),
            ),
            compiler_params=pltpu.CompilerParams(
                dimension_semantics=("parallel",),
                vmem_limit_bytes=vmem_limit,
            ),
            input_output_aliases=io_aliases,
        )(x_flat, weight, bias.reshape(c_out, 1))
    else:
        # Split scheme: hoist the gate as one batched (N, C) @ (C, C) op (extra HBM
        # read of x, accepted only when fused can't fit VMEM or for v7x N==1), then
        # the Pallas kernel is a broadcast multiply tiled over (N, HW), both axes
        # parallel so both TensorCores get work even at N == 1.
        pooled = jnp.mean(x_flat.astype(jnp.float32), axis=2)                     # (N, C)
        z = pooled @ weight.astype(jnp.float32).T + bias.astype(jnp.float32)
        gate = jax.nn.sigmoid(z)[:, :, None]                                      # (N, C, 1)

        tile_hw = _pick_tile_hw(hw, c, x_itemsize, budget, n, num_cores)
        split_need = 4 * c * tile_hw * x_itemsize + 4 * c * 4
        vmem_limit = int(min(0.9 * capacity, max(split_need + (4 << 20), 32 << 20)))
        out_flat = pl.pallas_call(
            _arm_mul_kernel,
            out_shape=jax.ShapeDtypeStruct((n, c, hw), x_nchw.dtype),
            grid_spec=pltpu.PrefetchScalarGridSpec(
                num_scalar_prefetch=0,
                grid=(n, pl.cdiv(hw, tile_hw)),
                in_specs=[
                    pl.BlockSpec((1, c, tile_hw), lambda i, j: (i, 0, j)),
                    pl.BlockSpec((1, c, 1), lambda i, j: (i, 0, 0)),
                ],
                out_specs=pl.BlockSpec((1, c, tile_hw), lambda i, j: (i, 0, j)),
            ),
            compiler_params=pltpu.CompilerParams(
                dimension_semantics=("parallel", "parallel"),
                vmem_limit_bytes=vmem_limit,
            ),
            input_output_aliases=io_aliases,
        )(x_flat, gate)

    return out_flat.reshape(n, c, h, w)


def _reference(x_nchw, weight, bias):
    # Pure-JAX reference mirroring the PyTorch forward.
    pooled = jnp.mean(x_nchw.astype(jnp.float32), axis=(2, 3))      # (N, C)
    z = pooled @ weight.astype(jnp.float32).T + bias.astype(jnp.float32)
    gate = jax.nn.sigmoid(z)[:, :, None, None]                      # (N, C, 1, 1)
    return (x_nchw.astype(jnp.float32) * gate).astype(x_nchw.dtype)


if __name__ == "__main__":
    key = jax.random.PRNGKey(0)
    k_x, k_w, k_b = jax.random.split(key, 3)

    # NOTE: C=4 under-fills the 8-sublane vreg; real BiSeNet ARM uses C in {128,256,512}.
    # These shapes exercise correctness only, not performance.
    N, C, H, W = 2, 4, 16, 16

    x = jax.random.normal(k_x, (N, C, H, W), dtype=jnp.float32)
    # Deterministic synthetic conv1x1 parameters (shape from nn.Conv2d(C, C, 1)).
    weight = jax.random.normal(k_w, (C, C), dtype=jnp.float32) * 0.1
    bias = jax.random.normal(k_b, (C,), dtype=jnp.float32) * 0.1

    ref = _reference(x, weight, bias)

    # Default path (fused, double-buffered whole-image blocks).
    out = jax.block_until_ready(attention_refinement_module(x, weight, bias))
    assert out.shape == (N, C, H, W)
    assert jnp.allclose(out, ref, atol=1e-4, rtol=1e-4), "fused (double-buffered) mismatch"

    # Single-buffered fused fallback (what large images take on v7x's 64 MiB VMEM).
    out_sb = jax.block_until_ready(
        attention_refinement_module(x, weight, bias, force_single_buffered=True))
    assert jnp.allclose(out_sb, ref, atol=1e-4, rtol=1e-4), "fused (single-buffered) mismatch"

    # Split (precomputed-gate) fallback.
    out_split = jax.block_until_ready(
        attention_refinement_module(x, weight, bias, force_split=True))
    assert jnp.allclose(out_split, ref, atol=1e-4, rtol=1e-4), "split path mismatch"

    # Optional buffer-donation variant (input_output_aliases={0: 0}).
    x2 = x + 0.0
    out_don = jax.block_until_ready(
        attention_refinement_module(x2, weight, bias, donate_input=True))
    assert jnp.allclose(out_don, ref, atol=1e-4, rtol=1e-4), "donated-input mismatch"

    print("KERNEL_OK")
</pallas_src>

<mosaic_0001>
module attributes {stable_mosaic.version = 11 : i64} {
  func.func @_arm_fused_kernel(%arg0: i32, %arg1: memref<1x4x256xf32, #tpu.memory_space<vmem>>, %arg2: memref<4x4xf32, #tpu.memory_space<vmem>>, %arg3: memref<4x1xf32, #tpu.memory_space<vmem>>, %arg4: memref<1x4x256xf32, #tpu.memory_space<vmem>>) attributes {dimension_semantics = [#tpu.dimension_semantics<parallel>], iteration_bounds = array<i64: 2>, scalar_prefetch = 0 : i64, scratch_operands = 0 : i64, tpu.core_type = #tpu.core_type<tc>, window_params = [{transform_indices = @transform_0, window_bounds = array<i64: 1, 4, 256>}, {pipeline_mode = #tpu.pipeline_mode<synchronous>, transform_indices = @transform_1, window_bounds = array<i64: 4, 4>}, {pipeline_mode = #tpu.pipeline_mode<synchronous>, transform_indices = @transform_2, window_bounds = array<i64: 4, 1>}, {transform_indices = @transform_3, window_bounds = array<i64: 1, 4, 256>}]} {
    %c0 = arith.constant 0 : index
    %c0_0 = arith.constant 0 : index
    %c0_1 = arith.constant 0 : index
    %0 = vector.load %arg1[%c0, %c0_0, %c0_1] : memref<1x4x256xf32, #tpu.memory_space<vmem>>, vector<1x4x256xf32>
    %1 = vector.shape_cast %0 : vector<1x4x256xf32> to vector<4x256xf32>
    %cst = arith.constant 1.000000e+00 : f32
    %2 = vector.broadcast %cst : f32 to vector<256x1xf32>
    %cst_2 = arith.constant dense<0.000000e+00> : vector<4x1xf32>
    %3 = tpu.matmul %1, %2, %cst_2 {dimension_numbers = #tpu.dot_dimension_numbers<[1], [0], [0], [1], [0, 0, 1, 1], [], []>} : vector<4x256xf32>, vector<256x1xf32>, vector<4x1xf32> -> vector<4x1xf32>
    %cst_3 = arith.constant 3.906250e-03 : f32
    %4 = vector.broadcast %cst_3 : f32 to vector<4x1xf32>
    %5 = arith.mulf %3, %4 : vector<4x1xf32>
    %c0_4 = arith.constant 0 : index
    %c0_5 = arith.constant 0 : index
    %6 = vector.load %arg2[%c0_4, %c0_5] : memref<4x4xf32, #tpu.memory_space<vmem>>, vector<4x4xf32>
    %cst_6 = arith.constant dense<0.000000e+00> : vector<4x1xf32>
    %7 = tpu.matmul %6, %5, %cst_6 {dimension_numbers = #tpu.dot_dimension_numbers<[1], [0], [0], [1], [0, 0, 1, 1], [], []>} : vector<4x4xf32>, vector<4x1xf32>, vector<4x1xf32> -> vector<4x1xf32>
    %c0_7 = arith.constant 0 : index
    %c0_8 = arith.constant 0 : index
    %8 = vector.load %arg3[%c0_7, %c0_8] : memref<4x1xf32, #tpu.memory_space<vmem>>, vector<4x1xf32>
    %9 = arith.addf %7, %8 : vector<4x1xf32>
    %10 = arith.negf %9 : vector<4x1xf32>
    %11 = math.exp %10 : vector<4x1xf32>
    %cst_9 = arith.constant 1.000000e+00 : f32
    %12 = vector.broadcast %cst_9 : f32 to vector<4x1xf32>
    %13 = arith.addf %12, %11 : vector<4x1xf32>
    %14 = arith.divf %12, %13 : vector<4x1xf32>
    %15 = vector.broadcast %14 : vector<4x1xf32> to vector<4x256xf32>
    %16 = arith.mulf %1, %15 : vector<4x256xf32>
    %c0_10 = arith.constant 0 : index
    %c0_11 = arith.constant 0 : index
    %c0_12 = arith.constant 0 : index
    %17 = vector.load %arg4[%c0_10, %c0_11, %c0_12] : memref<1x4x256xf32, #tpu.memory_space<vmem>>, vector<1x4x256xf32>
    %18 = vector.shape_cast %17 : vector<1x4x256xf32> to vector<4x256xf32>
    %19 = vector.shape_cast %16 : vector<4x256xf32> to vector<1x4x256xf32>
    tpu.vector_store %arg4[%c0_10, %c0_11, %c0_12], %19 {strides = array<i32>} : memref<1x4x256xf32, #tpu.memory_space<vmem>>, vector<1x4x256xf32>,
    return
  }
  func.func @transform_0(%arg0: i32) -> (i32, i32, i32) {
    %c0_i32 = arith.constant 0 : i32
    %c0_i32_0 = arith.constant 0 : i32
    %c0_i32_1 = arith.constant 0 : i32
    return %arg0, %c0_i32, %c0_i32_0 : i32, i32, i32
  }
  func.func @transform_1(%arg0: i32) -> (i32, i32) {
    %c0_i32 = arith.constant 0 : i32
    %c0_i32_0 = arith.constant 0 : i32
    %c0_i32_1 = arith.constant 0 : i32
    return %c0_i32, %c0_i32_0 : i32, i32
  }
  func.func @transform_2(%arg0: i32) -> (i32, i32) {
    %c0_i32 = arith.constant 0 : i32
    %c0_i32_0 = arith.constant 0 : i32
    %c0_i32_1 = arith.constant 0 : i32
    return %c0_i32, %c0_i32_0 : i32, i32
  }
  func.func @transform_3(%arg0: i32) -> (i32, i32, i32) {
    %c0_i32 = arith.constant 0 : i32
    %c0_i32_0 = arith.constant 0 : i32
    %c0_i32_1 = arith.constant 0 : i32
    return %arg0, %c0_i32, %c0_i32_0 : i32, i32, i32
  }
}

</mosaic_0001>

<bundles_post_ra>
// kernel: tpu_custom_call.1
= control target key start
LH: loop header
LB: loop body
LE: loop exit
PB: predicated region body
PF: predicated region fallthrough
CT: control target
= control target key end

     0   :  { %8 = vsyncpa [#allocation3], 0  ;;  %s843_s0 = inlined_call_operand.hbm [shape: f32[2,4,256], index: 0, kind: input, shape index: {}]   ;;  %s844_s1 = inlined_call_operand.vmem [shape: f32[4,4], index: 1, kind: input, shape index: {}]   ;;  %s845_s2 = inlined_call_operand.vmem [shape: f32[4,1], index: 2, kind: input, shape index: {}]   ;;  %s846_s3 = inlined_call_operand.hbm [shape: f32[2,4,256], index: 3, kind: output, shape index: {}]  }
   0x1   :  { %10 = vsyncpa [#allocation3 + $0x1], 0 }
   0x2   :  { %11 = vsyncpa [#allocation4], 0 }
   0x3   :  { %13 = vsyncpa [#allocation4 + $0x1], 0  ;;  %s686_s12 = smov 0   ;;  %s688_s13 = smov 0  }
   0x4   :  { %s690_s14 = smov 0   ;;  %s692_s15 = smov 0  }
   0x5 LB: > { %s707_s16 = sadd.s32 4294967295, %s657_s15   ;;  %s447_s17 = sadd.s32 4294967294, %s657_s15   ;;  %s657_s15 = sphi %s692_s15, %s863_s15   ;;  %s653_s14 = sphi %s690_s14, %s862_s14   ;;  %s649_s13 = sphi %s688_s13, %s861_s13   ;;  %s645_s12 = sphi %s686_s12, %s860_s12  }
   0x6   : > { %s711_s18 = sadd.s32 1, %s657_s15   ;;  %s26_s19 = sadd.s32 1, %s653_s14 }
   0x7   : > { %s23_s20 = ssub.s32 %s657_s15, %s711_s18  ;;  %p33_p0 = scmp.ne.s32.totalorder %s653_s14, %s649_s13 }
   0x8   : > { %p24_p1 = scmp.eq.s32.totalorder %s23_s20, 0  ;;  %p34_p2 = scmp.eq.s32.totalorder %s657_s15, 0 }
   0x9   : > { %p39_p3 = scmp.ne.s32.totalorder %s649_s13, %s645_s12  ;;  %p40_p4 = scmp.eq.s32.totalorder %s707_s16, 0 }
   0xa   : > { %s723_s21 = scalar_select %p24_p1, %s653_s14, %s26_s19  }
   0xb   : > { %p725_p5 = por %p34_p2, %p33_p0  ;;  %p729_p6 = por %p40_p4, %p39_p3 }
   0xc   : > { %p105_p7 = scmp.eq.s32.totalorder %s707_s16, 1  ;;  %p111_p8 = scmp.eq.s32.totalorder %s447_s17, 1 }
   0xd   : > { %s850_s23 = scalar_select %p729_p6, 1, 0 }
   0xe   : > { %p520_p10 = scmp.lt.s32.totalorder %s657_s15, 2  ;;  %p736_p11 = por %p105_p7, %p33_p0 }
   0xf   : > { %p740_p12 = por %p111_p8, %p39_p3  ;;  %s137_s26 = sand.u32 1, %s653_s14  }
  0x10   : > { %s851_s24 = scalar_select %p736_p11, 1, 0 }
  0x11   : > { %s852_s25 = scalar_select %p740_p12, 1, 0 }
  0x12   : > { %s464_s27 = sshll.u32 %s657_s15, 7  ;;  %s450_s28 = sshll.u32 %s137_s26, 3 }
  0x13   : > { %s749_s4 = scalar_lea.hbm %s843_s0, %s464_s27  ;;  %s141_s5 = scalar_lea.vmem [#allocation2], %s450_s28 }
  0x14   : > { %s149_s6 = sshll.u32 %s141_s5, 4  ;;  %p753_p13 = pnand %p520_p10, %p725_p5  ;;  %s757_s6 = int_to_ptr.vmem [resolvable:$true] %s149_s6 }
  0x15   : > { %s138_s8 = scalar_lea.sflag [#allocation3], %s137_s26  ;;  %s565_s9 = scalar_lea.hbm %s749_s4, 128 }
  0x16   : > { %p566_p2 = scmp.ne.s32.totalorder %s749_s4, %s565_s9  ;;  %p567_p3 = pneg %p753_p13 }
  0x17   : > { %s570_s17 = scalar_lea.hbm %s843_s0, 256  ;;  %p571_p5 = scmp.lt.s32.totalorder %s749_s4, %s843_s0 }
  0x18   : > { %p568_p4 = pnand %p567_p3, %p566_p2  ;;  %p572_p8 = scmp.lt.s32.totalorder %s570_s17, %s565_s9 }
  0x1a   : > { %p569_p7 = pneg %p568_p4  ;;  %p573_p10 = por %p572_p8, %p571_p5 }
  0x1c   : > { %p574_p9 = pnand %p573_p10, %p569_p7 }
  0x1e   : > { %577 = shalt.err (!%p574_p9)
}
  0x1f   : > { %s578_s22 = scalar_lea.vmem %s757_s6, 128  ;;  %s659_s26 = smov [#allocation2]  }
  0x20   : > { %p579_p0 = scmp.ne.s32.totalorder %s757_s6, %s578_s22  ;;  %s583_s27 = sshll.u32 %s659_s26, 4  ;;  %s584_s27 = int_to_ptr.vmem [resolvable:$false] %s583_s27 }
  0x21   : > { %s585_s28 = scalar_lea.vmem %s584_s27, 256  ;;  %p586_p4 = scmp.lt.s32.totalorder %s757_s6, %s584_s27 }
  0x22   : > { %p581_p1 = pnand %p579_p0, %p567_p3  ;;  %p587_p12 = scmp.lt.s32.totalorder %s585_s28, %s578_s22 }
  0x24   : > { %p582_p2 = pneg %p581_p1  ;;  %p588_p11 = por %p587_p12, %p586_p4 }
  0x26   : > { %p589_p6 = pnand %p588_p11, %p582_p2 }
  0x28   : > { %592 = shalt.err (!%p589_p6)
}
  0x29   : > { %515 = dma.hbm_to_vmem [thread:$0]  (!%p753_p13), %s749_s4, 128, %s757_s6, %s138_s8  }
  0x2a   : > { %p854_p9 = scmp.lt.s32.totalorder %s657_s15, 3  ;;  %p855_p7 = scmp.ge.s32.totalorder %s657_s15, 1 }
  0x2c   : > { %p155_p0 = pnand %p855_p7, %p854_p9 }
  0x2d   : > { %s784_s29 = sand.u32 (!%p155_p0), 1, %s649_s13   ;;  %p856_p6 = scmp.ne.s32.totalorder (!%p155_p0), %s850_s23, 0 }
  0x2e   : > { %158 = sbr.rel (%p155_p0) target bundleno = 653 (0x28d), region = 32  ;;  %s454_s30 = sshll.u32 (!%p155_p0), %s784_s29, 3 }
  0x2f   : > { %s161_s5 = scalar_lea.sflag (!%p155_p0), [#allocation3], %s784_s29  ;;  %s164_s7 = scalar_lea.vmem (!%p155_p0), [#allocation2], %s454_s30 }
  0x33   : > { %636 = dma.done.wait (%p856_p6), %s161_s5, 128  }
  0x34   : > { %638 = vsyncadd (%p856_p6), %s161_s5, 4294967168  ;;  %v660_v0 = vmov 1.0   ;;  %v794_v1 = vld [vmem:[%s164_s7] sm:$0xff]  ;;  %v661_v3 = vmov 0.0   ;;  %vm662_vm0 = vmmov 0   ;;  %vm268_vm1 = vcmask 1043456  }
  0x35   : > { %466 = vmatprep.subr.mxu0 %v660_v0  ;;  %v189_v2 = vcombine.high %v794_v1, %v794_v1  ;;  %503 = vmatprep.subr.mxu1 %v661_v3  ;;  %v262_v8 = vld [vmem:[%s844_s1] sm:$0xf]  ;;  %vm264_vm2 = vcmask 31744   ;;  %v663_v9 = vmov 0   ;;  %v664_v18 = vmov 839922192  }
  0x36   : > { %467 = vmatpush3.msra.mxu0 %v660_v0  ;;  %505 = vmatprep.mubr.msk.f32.mxu1 %vm662_vm0, %v661_v3  ;;  %v263_v10 = vld [vmem:[%s845_s2] sm:$0xf]  ;;  %v353_v19 = vunpack.c.l.s4 %v664_v18  ;;  %v355_v20 = vlaneseq  ;;  %s465_s9 = sshll.u32 %s707_s16, 7  ;;  %s186_s10 = scalar_lea.vmem [#allocation5], %s454_s30 }
  0x37   : > { %468 = vmatprep.subr.mxu0 %v660_v0  ;;  %255 = vmatprep.mubr.f32.mxu0 %v189_v2  ;;  %s377_s11 = sshll.u32 %s186_s10, 4  ;;  %s375_s20 = scalar_lea.hbm %s846_s3, %s465_s9  ;;  %s378_s11 = int_to_ptr.vmem [resolvable:$true] %s377_s11 }
  0x38   : > { %469 = vmatpush3.msra.mxu0 %v660_v0  ;;  %559 = vset.pattern.permute.xlu0 %v663_v9  ;;  %v354_v21 = vunpack.c.0.s8 %v353_v19  ;;  %v356_v22 = vshrl.u32 %v355_v20, 7  ;;  %s363_s22 = scalar_lea.sflag [#allocation4], %s784_s29  ;;  %s593_s26 = scalar_lea.vmem %s378_s11, 128 }
  0x39   : > { %470 = vmatprep.subr.mxu0 %v660_v0  ;;  %p594_p11 = scmp.ne.s32.totalorder %s378_s11, %s593_s26  ;;  %p857_p12 = scmp.ne.s32.totalorder %s851_s24, 0 }
  0x3a   : > { %471 = vmatpush3.msra.mxu0 %v660_v0  ;;  %v357_v23 = vsub.s32 %v354_v21, %v356_v22  ;;  %s665_s27 = smov [#allocation5]  }
  0x3b   : > { %472 = vmatprep.subr.mxu0 %v660_v0  ;;  %p595_p13 = pnand %p594_p11, %p857_p12  ;;  %s597_s16 = sshll.u32 %s665_s27, 4  ;;  %s598_s16 = int_to_ptr.vmem [resolvable:$false] %s597_s16 }
  0x3c   : > { %473 = vmatpush3.msra.mxu0 %v660_v0  ;;  %s599_s28 = scalar_lea.vmem %s598_s16, 256  ;;  %p600_p3 = scmp.lt.s32.totalorder %s378_s11, %s598_s16 }
  0x3d   : > { %474 = vmatprep.subr.mxu0 %v660_v0  ;;  %p596_p1 = pneg %p595_p13  ;;  %p601_p5 = scmp.lt.s32.totalorder %s599_s28, %s593_s26 }
  0x3e   : > { %475 = vmatpush3.msra.mxu0 %v660_v0 }
  0x3f   : > { %476 = vmatprep.subr.mxu0 %v660_v0  ;;  %p602_p8 = por %p601_p5, %p600_p3 }
  0x40   : > { %477 = vmatpush3.msra.mxu0 %v660_v0 }
  0x41   : > { %478 = vmatprep.subr.mxu0 %v660_v0  ;;  %p603_p10 = pnand %p602_p8, %p596_p1 }
  0x42   : > { %479 = vmatpush3.msra.mxu0 %v660_v0 }
  0x43   : > { %480 = vmatprep.subr.mxu0 %v660_v0 }
  0x44   : > { %481 = vmatpush3.msra.mxu0 %v660_v0 }
  0x45   : > { %482 = vmatprep.subr.mxu0 %v660_v0 }
  0x46   : > { %483 = vmatpush3.msra.mxu0 %v660_v0 }
  0x47   : > { %484 = vmatprep.subr.mxu0 %v660_v0 }
  0x48   : > { %485 = vmatpush3.msra.mxu0 %v660_v0 }
  0x49   : > { %486 = vmatprep.subr.mxu0 %v660_v0 }
  0x4a   : > { %487 = vmatpush3.msra.mxu0 %v660_v0 }
  0x4b   : > { %488 = vmatprep.subr.mxu0 %v660_v0 }
  0x4c   : > { %489 = vmatpush3.msra.mxu0 %v660_v0 }
  0x4d   : > { %490 = vmatprep.subr.mxu0 %v660_v0 }
  0x4e   : > { %491 = vmatpush3.msra.mxu0 %v660_v0 }
  0x4f   : > { %492 = vmatprep.subr.mxu0 %v660_v0 }
  0x50   : > { %493 = vmatpush3.msra.mxu0 %v660_v0 }
  0x51   : > { %494 = vmatprep.subr.mxu0 %v660_v0 }
  0x52   : > { %495 = vmatpush3.msra.mxu0 %v660_v0 }
  0x53   : > { %496 = vmatprep.subr.mxu0 %v660_v0 }
  0x54   : > { %497 = vmatpush3.msra.mxu0 %v660_v0 }
  0x55   : > { %256 = vmatmul.mubr.f32.vlgmr.msra.gmra.mxu0 %v794_v1 }
 0x115   : > { %v498_v4 = vpop.f32.mrf.mxu0 }
 0x117   : > { %v499_v5 = vpop.f32.mrf.mxu0 }
 0x118   : > { %v500_v6 = vadd.f32 %v499_v5, %v498_v4 }
 0x11a   : > { %v261_v7 = vmul.f32 0.00390625, %v500_v6 }
 0x11c   : > { %504 = vmatpush3.msk.msra.mxu1 %vm268_vm1, %v261_v7 }
 0x11d   : > { %506 = vmatmul.mubr.msk.f32.vlgmr.msra.gmra.mxu1 %vm264_vm2, %v262_v8 }
 0x1dd   : > { %v338_v11 = vpop.f32.mrf.mxu1 }
 0x1de   : > { %v339_v12 = vadd.f32 %v338_v11, %v263_v10 }
 0x1df   : > { %v507_v13 = vpop.f32.mrf.mxu1 }
 0x1e0   : > { %v458_v14 = vmul.f32 -1.442695, %v339_v12 }
 0x1e2   : > { %561 = vpow2.f32 %v458_v14 }
 0x1ef   : > { %v562_v15 = vpop.eup %561 }
 0x1f0   : > { %v345_v16 = vadd.f32 1.0, %v562_v15 }
 0x1f2   : > { %563 = vrcp.f32 %v345_v16 }
 0x1ff   : > { %v564_v17 = vpop.eup %563 }
 0x200   : > { %350 = vperm.xlu0 %559, %v564_v17  }
 0x27b   : > { %v351_v24 = vpop.permute.xlu0 %350 }
 0x27c   : > { %v358_v25 = vrot.slane %v351_v24, %v357_v23 }
 0x27e   : > { %v360_v26 = vmul.f32 %v358_v25, %v794_v1 }
 0x280   : > { %361 = vst [vmem:[%s186_s10] sm:$0xff] %v360_v26 }
 0x281   : > { %606 = shalt.err (!%p603_p10)
}
 0x282   : > { %s607_s30 = scalar_lea.hbm %s375_s20, 128  ;;  %s611_s7 = scalar_lea.hbm %s846_s3, 256 }
 0x283   : > { %p608_p2 = scmp.ne.s32.totalorder %s375_s20, %s607_s30  ;;  %p612_p7 = scmp.lt.s32.totalorder %s375_s20, %s846_s3 }
 0x284   : > { %p613_p0 = scmp.lt.s32.totalorder %s611_s7, %s607_s30 }
 0x285   : > { %p609_p4 = pnand %p608_p2, %p857_p12 }
 0x286   : > { %p614_p6 = por %p613_p0, %p612_p7 }
 0x287   : > { %p610_p9 = pneg %p609_p4 }
 0x289   : > { %p615_p11 = pnand %p614_p6, %p610_p9 }
 0x28b   : > { %618 = shalt.err (!%p615_p11)
}
 0x28c   : > { %510 = dma.vmem_to_hbm [thread:$0]  (%p857_p12), %s378_s11, 128, %s375_s20, %s363_s22  }
 0x28d PF: > { %s389_s6 = sand.u32 1, %s645_s12   ;;  %p858_p13 = scmp.ne.s32.totalorder %s852_s25, 0 }
 0x28e   : > { %p859_p1 = scmp.ge.s32.totalorder %s657_s15, 2  ;;  %s390_s8 = scalar_lea.sflag [#allocation4], %s389_s6 }
 0x290   : > { %p517_p3 = pnand %p859_p1, %p858_p13 }
 0x292   : > { %p518_p5 = pneg %p517_p3 }
 0x294   : > { %640 = dma.done.wait (%p518_p5), %s390_s8, 128  }
 0x295   : > { %642 = vsyncadd (%p518_p5), %s390_s8, 4294967168  ;;  %p16_p8 = scmp.ge.s32.totalorder %s711_s18, 4   ;;  %s860_s12 = smov %s649_s13 }
 0x296   : > { %s861_s13 = smov %s653_s14  ;;  %s862_s14 = smov %s723_s21 }
 0x297   : > { %s863_s15 = smov %s711_s18  ;;  %18 = sbr.rel (!%p16_p8) target bundleno = 5 (0x5), region = 77 }
 0x29c   :  { %395 = vsyncpa [#allocation3], 1 }
 0x29d   :  { %397 = vsyncpa [#allocation3 + $0x1], 1 }
 0x29e   :  { %398 = vsyncpa [#allocation4], 1 }
 0x29f   :  { %400 = vsyncpa [#allocation4 + $0x1], 1 }

</bundles_post_ra>
